<compile_context>
chip_gen: v6e
topology: v6e:2x2x1
jax: 0.10.0
libtpu: 0.0.40
codegen_flags: <defaults>
</compile_context>

<pallas_src>
import functools

import jax
import jax.numpy as jnp
import numpy as np
from jax.experimental import pallas as pl
from jax.experimental.pallas import tpu as pltpu


# ------------------------------ Pallas kernel -------------------------------

def fused_cnn_kernel(a1_ref, w1_ref, b1_ref, w2_ref, b2_ref, wt_ref, bt_ref,
                     out_ref, *, n, ph, pw, c1):
    """Whole forward pass in one grid step.

    a1_ref : (4*n*pw, ph*9*cin) bf16  conv1 im2col; 4 pool-tap blocks stacked
                                      on rows, lanes = (pooled row u, k)
    w1_ref : (ph*9*cin, ph*c1)   bf16  kron(I_ph, conv1 weight)
    b1_ref : (1, ph*c1)          f32   conv1 bias tiled over u
    w2_ref : (9*ph*c1, ph*c2)    bf16  conv2 weight, block-diagonal over u
    b2_ref : (1, ph*c2)          f32   conv2 bias tiled over u
    wt_ref : (ph*c2, 2*H)        bf16  tconv weight with the (di,dj)->(h,w)
                                       interleave baked in (cols = (dj, h))
    bt_ref : (1,)                f32   tconv bias scalar (SMEM)
    out_ref: (n*pw, 2*H)         f32   rows=(n, v), cols=(dj, h)
    """
    r = n * pw                                     # rows = (image, pooled col v)

    # ---- conv1 (+ the 4 pool taps stacked on rows): one MXU matmul ----------
    z1 = jnp.dot(a1_ref[...], w1_ref[...],
                 preferred_element_type=jnp.float32)        # (4r, ph*c1) f32

    # 2x2 max-pool == max over the 4 tap row-blocks; the shared bias and the
    # monotone ReLU commute with the max, so they are applied once afterwards.
    pooled = jnp.maximum(jnp.maximum(z1[0:r], z1[r:2 * r]),
                         jnp.maximum(z1[2 * r:3 * r], z1[3 * r:4 * r]))
    pooled = jnp.maximum(pooled + b1_ref[...], 0.0)          # (r, ph*c1) f32
    pooled = pooled.astype(jnp.bfloat16)                     # cast once, up front

    # ---- conv2 zero padding as values (no scratch round-trip) ---------------
    # pad +1 pooled column (v) on each side along sublanes, +1 pooled row (u)
    # on each side along lanes (u lives in the lane axis, c1 lanes per u).
    img = pooled.reshape(n, pw, ph * c1)
    zv = jnp.zeros((n, 1, ph * c1), jnp.bfloat16)
    img = jnp.concatenate([zv, img, zv], axis=1)             # (n, pw+2, ph*c1)
    zu = jnp.zeros((n, pw + 2, c1), jnp.bfloat16)
    img = jnp.concatenate([zu, img, zu], axis=2)             # (n, pw+2, (ph+2)*c1)

    # ---- conv2 im2col: 9 unit-stride windows lane-concatenated -> one matmul
    taps = [img[:, dx:dx + pw, dy * c1:(dy + ph) * c1].reshape(r, ph * c1)
            for dy in range(3) for dx in range(3)]           # q = dy*3+dx order
    a2 = jnp.concatenate(taps, axis=-1)                      # (r, 9*ph*c1) bf16
    z2 = jnp.dot(a2, w2_ref[...],
                 preferred_element_type=jnp.float32)         # (r, ph*c2) f32
    act2 = jnp.maximum(z2 + b2_ref[...], 0.0).astype(jnp.bfloat16)

    # ---- ConvTranspose2d(k=2, s=2) + tap->pixel interleave: one matmul ------
    out_ref[...] = jnp.dot(act2, wt_ref[...],
                           preferred_element_type=jnp.float32) + bt_ref[0]


# -------------------------------- JAX glue ----------------------------------

def cnn_forward(x_nchw, params):
    w1, b1, w2, b2, wt, bt = params
    n, cin, h, w = x_nchw.shape
    assert h % 2 == 0 and w % 2 == 0, "2x2 pool / k=2,s=2 tconv require even H, W"
    ph, pw = h // 2, w // 2
    c1 = w1.shape[0]          # 16
    c2 = w2.shape[0]          # 16
    f32 = jnp.float32

    # ---------------- host/XLA-side layout prep (all tiny, one-off) ----------
    x_nhwc = jnp.transpose(x_nchw, (0, 2, 3, 1)).astype(f32)
    xpad = jnp.pad(x_nhwc, ((0, 0), (1, 1), (1, 1), (0, 0)))
    # im9[n, i, j, k] = xpad[n, i+dy, j+dx, c]  with k = (dy*3+dx)*cin + c
    im9 = jnp.concatenate([xpad[:, dy:dy + h, dx:dx + w, :]
                           for dy in range(3) for dx in range(3)], axis=-1)
    # conv1 im2col: rows = (tap, n, v), lanes = (u, k); cast to bf16 ONCE here.
    blocks = []
    for di in range(2):
        for dj in range(2):
            sub = im9[:, di::2, dj::2, :]                    # (n, u, v, 9*cin)
            sub = jnp.transpose(sub, (0, 2, 1, 3))           # (n, v, u, 9*cin)
            blocks.append(sub.reshape(n * pw, ph * 9 * cin))
    a1 = jnp.concatenate(blocks, axis=0).astype(jnp.bfloat16)   # (4*n*pw, ph*9*cin)

    eye = jnp.eye(ph, dtype=f32)
    # conv1 weight -> block-diagonal over u:  (ph*9*cin, ph*c1)
    w1r = jnp.transpose(w1, (2, 3, 1, 0)).reshape(9 * cin, c1).astype(f32)
    w1bd = jnp.kron(eye, w1r).astype(jnp.bfloat16)
    b1w = jnp.tile(b1.astype(f32), ph).reshape(1, ph * c1)

    # conv2 weight -> block-diagonal over u, rows ordered (q, u, c):
    w2r9 = jnp.transpose(w2, (2, 3, 1, 0)).reshape(9, c1, c2).astype(f32)
    w2bd = jnp.einsum('qco,uv->qucvo', w2r9, eye).reshape(9 * ph * c1, ph * c2)
    w2bd = w2bd.astype(jnp.bfloat16)
    b2w = jnp.tile(b2.astype(f32), ph).reshape(1, ph * c2)

    # tconv weight with the 2x2-tap -> output-pixel interleave baked in:
    #   wbig[(u, c), (dj, hh)] = wt[c, 0, di, dj]  iff  hh == 2u + di
    wtc = wt.reshape(c2, 2, 2).astype(f32)                          # (c, di, dj)
    sel = (jnp.arange(2 * ph)[None, None, :] ==
           2 * jnp.arange(ph)[None, :, None] + jnp.arange(2)[:, None, None]
           ).astype(f32)                                            # (di, u, hh)
    wbig = jnp.einsum('duh,cde->uceh', sel, wtc).reshape(ph * c2, 2 * h)
    wbig = wbig.astype(jnp.bfloat16)
    btv = bt.reshape(1).astype(f32)

    vmem = pl.BlockSpec(memory_space=pltpu.MemorySpace.VMEM)
    smem = pl.BlockSpec(memory_space=pltpu.MemorySpace.SMEM)
    kern = functools.partial(fused_cnn_kernel, n=n, ph=ph, pw=pw, c1=c1)

    flops = 2 * (a1.shape[0] * a1.shape[1] * w1bd.shape[1]
                 + (n * pw) * w2bd.shape[0] * w2bd.shape[1]
                 + (n * pw) * wbig.shape[0] * wbig.shape[1])
    bytes_accessed = (sum(int(a.size) * a.dtype.itemsize
                          for a in (a1, w1bd, b1w, w2bd, b2w, wbig, btv))
                      + n * pw * 2 * h * 4)

    # Single grid step: the whole problem (<0.5 MiB) fits VMEM on every TPU
    # generation, so per-step pipelining overhead would only hurt.
    # TODO(synk): if N*H*W grows, add a grid axis over rows (n, v) with
    # dimension_semantics=("parallel",) and size tiles against v7x's 64 MiB
    # VMEM / 2 TensorCores; at this toy size splitting is pure overhead.
    z = pl.pallas_call(
        kern,
        out_shape=jax.ShapeDtypeStruct((n * pw, 2 * h), jnp.float32),
        in_specs=[vmem, vmem, vmem, vmem, vmem, vmem, smem],
        out_specs=vmem,
        cost_estimate=pl.CostEstimate(flops=flops, transcendentals=0,
                                      bytes_accessed=bytes_accessed),
    )(a1, w1bd, b1w, w2bd, b2w, wbig, btv)                  # (n*pw, 2*H)

    # rows = (n, v), cols = (dj, h)  ->  (N, W, H) is a zero-copy reshape
    # (exactly torch's x.transpose(1, -1).squeeze(); squeeze also handles N==1).
    y = z.reshape(n, w, h)
    return jnp.squeeze(y)


# ---------------------- pure-JAX reference (for check) ----------------------

def torch_reference(x, w1, b1, w2c, b2, wt, bt):
    # Faithful re-implementation of the torch module.  Activations/weights are
    # rounded to bf16 exactly where the Pallas kernel feeds the MXU (all
    # accumulation stays f32), so the comparison isolates indexing/semantics.
    q = lambda a: a.astype(jnp.bfloat16).astype(jnp.float32)
    hi = jax.lax.Precision.HIGHEST
    dn = ('NCHW', 'OIHW', 'NCHW')
    y = jax.lax.conv_general_dilated(q(x), q(w1), (1, 1), ((1, 1), (1, 1)),
                                     dimension_numbers=dn, precision=hi)
    y = jnp.maximum(y + b1[None, :, None, None], 0.0)
    y = jax.lax.reduce_window(y, -jnp.inf, jax.lax.max, (1, 1, 2, 2),
                              (1, 1, 2, 2), 'VALID')
    y = jax.lax.conv_general_dilated(q(y), q(w2c), (1, 1), ((1, 1), (1, 1)),
                                     dimension_numbers=dn, precision=hi)
    y = jnp.maximum(y + b2[None, :, None, None], 0.0)
    # ConvTranspose2d(k=2, s=2, p=0) == dilated conv with flipped, transposed kernel
    wt_conv = jnp.transpose(wt, (1, 0, 2, 3))[:, :, ::-1, ::-1]
    y = jax.lax.conv_general_dilated(q(y), q(wt_conv), (1, 1), ((1, 1), (1, 1)),
                                     lhs_dilation=(2, 2), dimension_numbers=dn,
                                     precision=hi)
    y = y + bt[None, :, None, None]
    return jnp.squeeze(jnp.transpose(y, (0, 3, 2, 1)))   # transpose(1,-1).squeeze()


if __name__ == "__main__":
    key = jax.random.PRNGKey(0)
    kx, k1, k2, k3, k4, k5, k6 = jax.random.split(key, 7)
    N, C, H, W = 2, 3, 16, 16
    x = jax.random.normal(kx, (N, C, H, W), jnp.float32)

    # deterministic synthetic parameters (shapes from the module's __init__)
    w1 = jax.random.normal(k1, (16, 3, 3, 3), jnp.float32) * 0.2
    b1 = jax.random.normal(k2, (16,), jnp.float32) * 0.1
    w2 = jax.random.normal(k3, (16, 16, 3, 3), jnp.float32) * 0.1
    b2 = jax.random.normal(k4, (16,), jnp.float32) * 0.1
    wt = jax.random.normal(k5, (16, 1, 2, 2), jnp.float32) * 0.2
    bt = jax.random.normal(k6, (1,), jnp.float32) * 0.1
    params = (w1, b1, w2, b2, wt, bt)

    fwd = jax.jit(cnn_forward)
    out = jax.block_until_ready(fwd(x, params))
    ref = jax.block_until_ready(torch_reference(x, *params))

    assert out.shape == (N, W, H), out.shape
    np.testing.assert_allclose(np.asarray(out), np.asarray(ref),
                               atol=2e-3, rtol=2e-3)
    print("KERNEL_OK")
</pallas_src>

<mosaic_0001>
module attributes {stable_mosaic.version = 11 : i64} {
  func.func @fused_cnn_kernel(%arg0: memref<64x216xbf16, #tpu.memory_space<vmem>>, %arg1: memref<216x128xbf16, #tpu.memory_space<vmem>>, %arg2: memref<1x128xf32, #tpu.memory_space<vmem>>, %arg3: memref<1152x128xbf16, #tpu.memory_space<vmem>>, %arg4: memref<1x128xf32, #tpu.memory_space<vmem>>, %arg5: memref<128x32xbf16, #tpu.memory_space<vmem>>, %arg6: memref<1xf32, #tpu.memory_space<smem>>, %arg7: memref<16x32xf32, #tpu.memory_space<vmem>>) attributes {dimension_semantics = [], scalar_prefetch = 0 : i64, scratch_operands = 0 : i64, tpu.core_type = #tpu.core_type<tc>} {
    %c0 = arith.constant 0 : index
    %c0_0 = arith.constant 0 : index
    %0 = vector.load %arg0[%c0, %c0_0] : memref<64x216xbf16, #tpu.memory_space<vmem>>, vector<64x216xbf16>
    %c0_1 = arith.constant 0 : index
    %c0_2 = arith.constant 0 : index
    %1 = vector.load %arg1[%c0_1, %c0_2] : memref<216x128xbf16, #tpu.memory_space<vmem>>, vector<216x128xbf16>
    %cst = arith.constant dense<0.000000e+00> : vector<64x128xf32>
    %2 = tpu.matmul %0, %1, %cst {dimension_numbers = #tpu.dot_dimension_numbers<[1], [0], [0], [1], [0, 0, 1, 1], [], []>} : vector<64x216xbf16>, vector<216x128xbf16>, vector<64x128xf32> -> vector<64x128xf32>
    %3 = vector.extract_strided_slice %2 {offsets = [0, 0], sizes = [16, 128], strides = [1, 1]} : vector<64x128xf32> to vector<16x128xf32>
    %4 = vector.extract_strided_slice %2 {offsets = [16, 0], sizes = [16, 128], strides = [1, 1]} : vector<64x128xf32> to vector<16x128xf32>
    %5 = arith.maximumf %3, %4 : vector<16x128xf32>
    %6 = vector.extract_strided_slice %2 {offsets = [32, 0], sizes = [16, 128], strides = [1, 1]} : vector<64x128xf32> to vector<16x128xf32>
    %7 = vector.extract_strided_slice %2 {offsets = [48, 0], sizes = [16, 128], strides = [1, 1]} : vector<64x128xf32> to vector<16x128xf32>
    %8 = arith.maximumf %6, %7 : vector<16x128xf32>
    %9 = arith.maximumf %5, %8 : vector<16x128xf32>
    %c0_3 = arith.constant 0 : index
    %c0_4 = arith.constant 0 : index
    %10 = vector.load %arg2[%c0_3, %c0_4] : memref<1x128xf32, #tpu.memory_space<vmem>>, vector<1x128xf32>
    %11 = vector.broadcast %10 : vector<1x128xf32> to vector<16x128xf32>
    %12 = arith.addf %9, %11 : vector<16x128xf32>
    %cst_5 = arith.constant 0.000000e+00 : f32
    %13 = vector.broadcast %cst_5 : f32 to vector<16x128xf32>
    %14 = arith.maximumf %12, %13 : vector<16x128xf32>
    %15 = arith.truncf %14 : vector<16x128xf32> to vector<16x128xbf16>
    %16 = vector.shape_cast %15 : vector<16x128xbf16> to vector<2x8x128xbf16>
    %cst_6 = arith.constant 0.000000e+00 : bf16
    %17 = vector.broadcast %cst_6 : bf16 to vector<2x1x128xbf16>
    %18 = tpu.concatenate %17, %16, %17 in 1 : vector<2x1x128xbf16>, vector<2x8x128xbf16>, vector<2x1x128xbf16> -> vector<2x10x128xbf16>
    %cst_7 = arith.constant 0.000000e+00 : bf16
    %19 = vector.broadcast %cst_7 : bf16 to vector<2x10x16xbf16>
    %20 = tpu.concatenate %19, %18, %19 in 2 : vector<2x10x16xbf16>, vector<2x10x128xbf16>, vector<2x10x16xbf16> -> vector<2x10x160xbf16>
    %21 = vector.extract_strided_slice %20 {offsets = [0, 0, 0], sizes = [2, 8, 128], strides = [1, 1, 1]} : vector<2x10x160xbf16> to vector<2x8x128xbf16>
    %22 = vector.shape_cast %21 : vector<2x8x128xbf16> to vector<16x128xbf16>
    %23 = vector.extract_strided_slice %20 {offsets = [0, 1, 0], sizes = [2, 8, 128], strides = [1, 1, 1]} : vector<2x10x160xbf16> to vector<2x8x128xbf16>
    %24 = vector.shape_cast %23 : vector<2x8x128xbf16> to vector<16x128xbf16>
    %25 = vector.extract_strided_slice %20 {offsets = [0, 2, 0], sizes = [2, 8, 128], strides = [1, 1, 1]} : vector<2x10x160xbf16> to vector<2x8x128xbf16>
    %26 = vector.shape_cast %25 : vector<2x8x128xbf16> to vector<16x128xbf16>
    %27 = vector.extract_strided_slice %20 {offsets = [0, 0, 16], sizes = [2, 8, 128], strides = [1, 1, 1]} : vector<2x10x160xbf16> to vector<2x8x128xbf16>
    %28 = vector.shape_cast %27 : vector<2x8x128xbf16> to vector<16x128xbf16>
    %29 = vector.extract_strided_slice %20 {offsets = [0, 1, 16], sizes = [2, 8, 128], strides = [1, 1, 1]} : vector<2x10x160xbf16> to vector<2x8x128xbf16>
    %30 = vector.shape_cast %29 : vector<2x8x128xbf16> to vector<16x128xbf16>
    %31 = vector.extract_strided_slice %20 {offsets = [0, 2, 16], sizes = [2, 8, 128], strides = [1, 1, 1]} : vector<2x10x160xbf16> to vector<2x8x128xbf16>
    %32 = vector.shape_cast %31 : vector<2x8x128xbf16> to vector<16x128xbf16>
    %33 = vector.extract_strided_slice %20 {offsets = [0, 0, 32], sizes = [2, 8, 128], strides = [1, 1, 1]} : vector<2x10x160xbf16> to vector<2x8x128xbf16>
    %34 = vector.shape_cast %33 : vector<2x8x128xbf16> to vector<16x128xbf16>
    %35 = vector.extract_strided_slice %20 {offsets = [0, 1, 32], sizes = [2, 8, 128], strides = [1, 1, 1]} : vector<2x10x160xbf16> to vector<2x8x128xbf16>
    %36 = vector.shape_cast %35 : vector<2x8x128xbf16> to vector<16x128xbf16>
    %37 = vector.extract_strided_slice %20 {offsets = [0, 2, 32], sizes = [2, 8, 128], strides = [1, 1, 1]} : vector<2x10x160xbf16> to vector<2x8x128xbf16>
    %38 = vector.shape_cast %37 : vector<2x8x128xbf16> to vector<16x128xbf16>
    %39 = tpu.concatenate %22, %24, %26, %28, %30, %32, %34, %36, %38 in 1 : vector<16x128xbf16>, vector<16x128xbf16>, vector<16x128xbf16>, vector<16x128xbf16>, vector<16x128xbf16>, vector<16x128xbf16>, vector<16x128xbf16>, vector<16x128xbf16>, vector<16x128xbf16> -> vector<16x1152xbf16>
    %c0_8 = arith.constant 0 : index
    %c0_9 = arith.constant 0 : index
    %40 = vector.load %arg3[%c0_8, %c0_9] : memref<1152x128xbf16, #tpu.memory_space<vmem>>, vector<1152x128xbf16>
    %cst_10 = arith.constant dense<0.000000e+00> : vector<16x128xf32>
    %41 = tpu.matmul %39, %40, %cst_10 {dimension_numbers = #tpu.dot_dimension_numbers<[1], [0], [0], [1], [0, 0, 1, 1], [], []>} : vector<16x1152xbf16>, vector<1152x128xbf16>, vector<16x128xf32> -> vector<16x128xf32>
    %c0_11 = arith.constant 0 : index
    %c0_12 = arith.constant 0 : index
    %42 = vector.load %arg4[%c0_11, %c0_12] : memref<1x128xf32, #tpu.memory_space<vmem>>, vector<1x128xf32>
    %43 = vector.broadcast %42 : vector<1x128xf32> to vector<16x128xf32>
    %44 = arith.addf %41, %43 : vector<16x128xf32>
    %cst_13 = arith.constant 0.000000e+00 : f32
    %45 = vector.broadcast %cst_13 : f32 to vector<16x128xf32>
    %46 = arith.maximumf %44, %45 : vector<16x128xf32>
    %47 = arith.truncf %46 : vector<16x128xf32> to vector<16x128xbf16>
    %c0_14 = arith.constant 0 : index
    %c0_15 = arith.constant 0 : index
    %48 = vector.load %arg5[%c0_14, %c0_15] : memref<128x32xbf16, #tpu.memory_space<vmem>>, vector<128x32xbf16>
    %cst_16 = arith.constant dense<0.000000e+00> : vector<16x32xf32>
    %49 = tpu.matmul %47, %48, %cst_16 {dimension_numbers = #tpu.dot_dimension_numbers<[1], [0], [0], [1], [0, 0, 1, 1], [], []>} : vector<16x128xbf16>, vector<128x32xbf16>, vector<16x32xf32> -> vector<16x32xf32>
    %c0_17 = arith.constant 0 : index
    %50 = memref.load %arg6[%c0_17] : memref<1xf32, #tpu.memory_space<smem>>
    %51 = vector.broadcast %50 : f32 to vector<16x32xf32>
    %52 = arith.addf %49, %51 : vector<16x32xf32>
    %c0_18 = arith.constant 0 : index
    %c0_19 = arith.constant 0 : index
    %53 = vector.load %arg7[%c0_18, %c0_19] : memref<16x32xf32, #tpu.memory_space<vmem>>, vector<16x32xf32>
    tpu.vector_store %arg7[%c0_18, %c0_19], %52 {strides = array<i32>} : memref<16x32xf32, #tpu.memory_space<vmem>>, vector<16x32xf32>,
    return
  }
}

</mosaic_0001>

<bundles_post_ra>
// kernel: mul.4
= control target key start
LH: loop header
LB: loop body
LE: loop exit
PB: predicated region body
PF: predicated region fallthrough
CT: control target
= control target key end

     0   :  { %vm47_vm0 = vcmask 130048   ;;  %s185_s0 = inlined_call_operand.vmem [shape: f32[3,3,3,16], index: 0, kind: input, shape index: {}]   ;;  %s186_s1 = inlined_call_operand.vmem [shape: f32[27,16], index: 1, kind: output, shape index: {}]  }
   0x1   :  { %v96_v0 = vld [vmem:[%s185_s0 + $0x20] sm:$0xf]  ;;  %v97_v1 = vld [vmem:[%s185_s0 + $0x1c] sm:$0xf]  ;;  %v98_v2 = vld [vmem:[%s185_s0 + $0x18] sm:$0xf] }
   0x2   :  { %9 = vst [vmem:[#allocation0 + $0x10] sm:$0xf] %v96_v0  ;;  %14 = vst [vmem:[#allocation0 + $0x40] sm:$0xf] %v97_v1  ;;  %v99_v3 = vld [vmem:[%s185_s0 + $0x14] sm:$0xf] }
   0x3   :  { %19 = vst [vmem:[#allocation0 + $0x28] sm:$0xf] %v98_v2  ;;  %v100_v4 = vld [vmem:[%s185_s0 + $0x10] sm:$0xf]  ;;  %v101_v5 = vld [vmem:[%s185_s0 + $0xc] sm:$0xf] }
   0x4   :  { %24 = vst [vmem:[#allocation0 + $0x30] sm:$0xf] %v99_v3  ;;  %29 = vst [vmem:[#allocation0 + $0x20] sm:$0xf] %v100_v4  ;;  %v102_v6 = vld [vmem:[%s185_s0 + $0x8] sm:$0xf] }
   0x5   :  { %34 = vst [vmem:[#allocation0 + $0x18] sm:$0xf] %v101_v5  ;;  %v103_v7 = vld [vmem:[%s185_s0 + $0x4] sm:$0xf]  ;;  %v44_v8 = vld [vmem:[%s185_s0] sm:$0xf] }
   0x6   :  { %39 = vst [vmem:[#allocation0] sm:$0xf] %v102_v6  ;;  %43 = vst [vmem:[#allocation0 + $0x8] sm:$0xf] %v103_v7 }
   0x7   :  { %45 = vst [vmem:[#allocation0 + $0x38] sm:$0xf] %v44_v8 }
   0x9   :  { %v80_v10 = vld [vmem:[#allocation0 + $0x40] sm:$0x7]   ;;  %v85_v11 = vld [vmem:[#allocation0 + $0x10] sm:$0x7]  }
   0xa   :  { %v75_v9 = vld [vmem:[#allocation0 + $0x28] sm:$0x7]   ;;  %110 = vst.msk [vmem:[%s186_s1 + $0x15] sm:$0x7] %vm47_vm0, %v80_v10   ;;  %111 = vst.msk [vmem:[%s186_s1 + $0x18] sm:$0x7] %vm47_vm0, %v85_v11  }
   0xb   :  { %v65_v13 = vld [vmem:[#allocation0 + $0x20] sm:$0x7]   ;;  %v70_v14 = vld [vmem:[#allocation0 + $0x30] sm:$0x7]   ;;  %109 = vst.msk [vmem:[%s186_s1 + $0x12] sm:$0x7] %vm47_vm0, %v75_v9  }
   0xc   :  { %v60_v12 = vld [vmem:[#allocation0 + $0x18] sm:$0x7]   ;;  %107 = vst.msk [vmem:[%s186_s1 + $0xc] sm:$0x7] %vm47_vm0, %v65_v13   ;;  %108 = vst.msk [vmem:[%s186_s1 + $0xf] sm:$0x7] %vm47_vm0, %v70_v14  }
   0xd   :  { %v50_v16 = vld [vmem:[#allocation0 + $0x8] sm:$0x7]   ;;  %v55_v17 = vld [vmem:[#allocation0] sm:$0x7]   ;;  %106 = vst.msk [vmem:[%s186_s1 + $0x9] sm:$0x7] %vm47_vm0, %v60_v12  }
   0xe   :  { %v46_v15 = vld [vmem:[#allocation0 + $0x38] sm:$0x7]   ;;  %104 = vst.msk [vmem:[%s186_s1 + $0x3] sm:$0x7] %vm47_vm0, %v50_v16   ;;  %105 = vst.msk [vmem:[%s186_s1 + $0x6] sm:$0x7] %vm47_vm0, %v55_v17  }
   0xf   :  { %48 = vst.msk [vmem:[%s186_s1] sm:$0x7] %vm47_vm0, %v46_v15  }

// kernel: tile.13
= control target key start
LH: loop header
LB: loop body
LE: loop exit
PB: predicated region body
PF: predicated region fallthrough
CT: control target
= control target key end

     0   :  { %s22_s0 = inlined_call_operand.vmem [shape: f32[16], index: 0, kind: input, shape index: {}]   ;;  %s23_s1 = inlined_call_operand.vmem [shape: f32[8,16], index: 1, kind: output, shape index: {}]  }
   0x1   :  { %v4_v0 = vld [vmem:[%s22_s0] ss:$0 sm:$0xff] }
   0x2   :  { %5 = vst [vmem:[%s23_s1] sm:$0xff] %v4_v0 }

// kernel: tile.14
= control target key start
LH: loop header
LB: loop body
LE: loop exit
PB: predicated region body
PF: predicated region fallthrough
CT: control target
= control target key end

     0   :  { %s69_s10 = smov 112   ;;  %s70_s11 = smov 80   ;;  %vm3_vm0 = vcmask 130048   ;;  %vm9_vm1 = vcmask 1048448   ;;  %vm15_vm2 = vcmask 917248   ;;  %vm21_vm3 = vcmask 786048   ;;  %s113_s0 = inlined_call_operand.vmem [shape: f32[8,16], index: 0, kind: input, shape index: {}]   ;;  %s114_s1 = inlined_call_operand.vmem [shape: f32[1,128], index: 1, kind: output, shape index: {}]  }
   0x1   :  { %v55_v0 = vld [vmem:[%s113_s0 + $0x7] sm:$0x1]   ;;  %v57_v1 = vld [vmem:[%s113_s0 + $0x5] sm:$0x1]   ;;  %v56_v2 = vld [vmem:[%s113_s0 + $0x6] sm:$0x1]  }
   0x2   :  { %7 = vrot.lane.b32.xlu0 %v55_v0, %s69_s10  ;;  %19 = vrot.lane.b32.xlu1 %v57_v1, %s70_s11  ;;  %v58_v3 = vld [vmem:[%s113_s0 + $0x4] sm:$0x1]   ;;  %v2_v4 = vld [vmem:[%s113_s0] sm:$0x1]   ;;  %s71_s18 = smov 96   ;;  %s72_s19 = smov 64  }
   0x3   :  { %4 = vst.msk [vmem:[#allocation0] sm:$0x1] %vm3_vm0, %v2_v4   ;;  %v59_v5 = vld [vmem:[%s113_s0 + $0x3] sm:$0x1]   ;;  %v60_v6 = vld [vmem:[%s113_s0 + $0x2] sm:$0x1]  }
   0x4   :  { %s73_s24 = smov 48   ;;  %s74_s25 = smov 32   ;;  %v61_v7 = vld [vmem:[%s113_s0 + $0x1] sm:$0x1]   ;;  %vm27_vm4 = vcmask 654848   ;;  %vm33_vm5 = vcmask 523648  }
   0x5   :  { %s75_s0 = smov 16   ;;  %vm39_vm6 = vcmask 392448   ;;  %vm45_vm7 = vcmask 261248  }
   0x6   :  { %13 = vrot.lane.b32.xlu0 %v56_v2, %s71_s18  ;;  %25 = vrot.lane.b32.xlu1 %v58_v3, %s72_s19 }
   0xa   :  { %31 = vrot.lane.b32.xlu0 %v59_v5, %s73_s24  ;;  %37 = vrot.lane.b32.xlu1 %v60_v6, %s74_s25 }
   0xe   :  { %43 = vrot.lane.b32.xlu0 %v61_v7, %s75_s0 }
  0x74   :  { %v8_v8 = vpop.permute.xlu0 %7   ;;  %v20_v9 = vpop.permute.xlu1 %19  }
  0x75   :  { %10 = vst.msk [vmem:[#allocation0] sm:$0x1] %vm9_vm1, %v8_v8  }
  0x78   :  { %v14_v10 = vpop.permute.xlu0 %13   ;;  %v26_v11 = vpop.permute.xlu1 %25  }
  0x79   :  { %16 = vst.msk [vmem:[#allocation0] sm:$0x1] %vm15_vm2, %v14_v10  }
  0x7a   :  { %22 = vst.msk [vmem:[#allocation0] sm:$0x1] %vm21_vm3, %v20_v9  }
  0x7b   :  { %28 = vst.msk [vmem:[#allocation0] sm:$0x1] %vm27_vm4, %v26_v11  }
  0x7c   :  { %v32_v12 = vpop.permute.xlu0 %31   ;;  %v38_v13 = vpop.permute.xlu1 %37  }
  0x7d   :  { %34 = vst.msk [vmem:[#allocation0] sm:$0x1] %vm33_vm5, %v32_v12  }
  0x7e   :  { %40 = vst.msk [vmem:[#allocation0] sm:$0x1] %vm39_vm6, %v38_v13  }
  0x80   :  { %v44_v14 = vpop.permute.xlu0 %43  }
  0x81   :  { %46 = vst.msk [vmem:[#allocation0] sm:$0x1] %vm45_vm7, %v44_v14  }
  0x88   :  { %v51_v15 = vld [vmem:[#allocation0] sm:$0x1] }
  0x89   :  { %54 = vst [vmem:[%s114_s1] sm:$0x1] %v51_v15 }

// kernel: cnn_forward.1
= control target key start
LH: loop header
LB: loop body
LE: loop exit
PB: predicated region body
PF: predicated region fallthrough
CT: control target
= control target key end

     0   :  { %v1779_v0 = vmov 0   ;;  %vm180_vm0 = vcmask 719872   ;;  %vm193_vm1 = vcmask 1043456   ;;  %vm301_vm2 = vcmask 1040384   ;;  %s1780_s25 = smov 16   ;;  %s1781_s14 = smov 112   ;;  %s2246_s1 = inlined_call_operand.vmem [shape: bf16[216,128], index: 1, kind: input, shape index: {}]   ;;  %s2247_s0 = inlined_call_operand.vmem [shape: bf16[64,216], index: 0, kind: input, shape index: {}]   ;;  %s2248_s3 = inlined_call_operand.vmem [shape: bf16[1152,128], index: 3, kind: input, shape index: {}]   ;;  %s2249_s2 = inlined_call_operand.vmem [shape: f32[1,128], index: 2, kind: input, shape index: {}]   ;;  %s2250_s5 = inlined_call_operand.vmem [shape: bf16[128,32], index: 5, kind: input, shape index: {}]   ;;  %s2251_s4 = inlined_call_operand.vmem [shape: f32[1,128], index: 4, kind: input, shape index: {}]   ;;  %s2252_s6 = inlined_call_operand.<no memory space> [shape: f32[1], index: 6, kind: input, shape index: {}]   ;;  %s2253_s7 = inlined_call_operand.vmem [shape: f32[16,32], index: 7, kind: output, shape index: {}]  }
   0x1   :  { %197 = vmatprep.subr.bf16.mxu0 %v1779_v0  ;;  %v1673_v1 = vld [vmem:[%s2246_s1 + $0x38] sm:$0xff]   ;;  %v1674_v2 = vld [vmem:[%s2246_s1 + $0x30] sm:$0xff]   ;;  %v1675_v3 = vld [vmem:[%s2246_s1 + $0x28] sm:$0xff]   ;;  %vm302_vm3 = vsmask.f32 256  ;;  %vm306_vm4 = vcmask 1044480  }
   0x2   :  { %198 = vmatpush1.bf16.msra.mxu0 %v1673_v1  ;;  %v1676_v4 = vld [vmem:[%s2246_s1 + $0x20] sm:$0xff]   ;;  %v1677_v5 = vld [vmem:[%s2246_s1 + $0x18] sm:$0xff]   ;;  %v1678_v7 = vld [vmem:[%s2246_s1 + $0x10] sm:$0xff]   ;;  %vm307_vm5 = vsmask.f32 4352  ;;  %vm317_vm8 = vcmask 130048  }
   0x3   :  { %199 = vmatprep.subr.bf16.mxu0 %v1779_v0  ;;  %v1689_v6 = vld [vmem:[%s2247_s0 + $0x4] ss:$8 sps:$4 sm:$0xff]   ;;  %v1681_v10 = vld [vmem:[%s2246_s1 + $0x68] ss:$0 sps:$4 sm:$0xff]   ;;  %v1683_v13 = vld [vmem:[%s2246_s1 + $0x58] sm:$0xff]   ;;  %vm366_vm9 = vcmask 1042432  }
   0x4   :  { %1411 = vmatprep.mubr.msk.bf16.mxu0 %vm180_vm0, %v1689_v6  ;;  %v1679_v8 = vld [vmem:[%s2246_s1 + $0x8] sm:$0xff]   ;;  %v1680_v9 = vld [vmem:[%s2246_s1] sm:$0xff]   ;;  %v195_v11 = vsel %vm193_vm1, %v1681_v10, 0  ;;  %v1684_v14 = vld [vmem:[%s2246_s1 + $0x50] sm:$0xff]   ;;  %vm367_vm10 = vcmask 1046532   ;;  %vm438_vm15 = vcmask 916480  }
   0x5   :  { %v1682_v12 = vld [vmem:[%s2246_s1 + $0x60] sm:$0xff]   ;;  %v1685_v15 = vld [vmem:[%s2246_s1 + $0x48] sm:$0xff]   ;;  %v1690_v18 = vld [vmem:[%s2247_s0 + $0x14] ss:$8 sps:$4 sm:$0xff]   ;;  %vm335_vm11 = vsmask.f32 3328 }
   0x6   :  { %200 = vmatpush1.bf16.msra.mxu0 %v1674_v2  ;;  %v1686_v16 = vld [vmem:[%s2246_s1 + $0x40] sm:$0xff]   ;;  %v1692_v19 = vld [vmem:[%s2247_s0 + $0x10] ss:$8 sps:$4 sm:$0xff]   ;;  %v1696_v22 = vld [vmem:[%s2247_s0 + $0x34] ss:$8 sps:$4 sm:$0xff]   ;;  %vm1784_vm1 = vmmov 0  }
   0x7   :  { %201 = vmatprep.subr.bf16.mxu0 %v1779_v0  ;;  %v1687_v17 = vld [vmem:[%s2247_s0] ss:$8 sps:$4 sm:$0xff]   ;;  %v1693_v20 = vld [vmem:[%s2247_s0 + $0x24] ss:$8 sps:$4 sm:$0xff]   ;;  %v1698_v23 = vld [vmem:[%s2247_s0 + $0x30] ss:$8 sps:$4 sm:$0xff]  }
   0x8   :  { %v1695_v21 = vld [vmem:[%s2247_s0 + $0x20] ss:$8 sps:$4 sm:$0xff]   ;;  %v1699_v24 = vld [vmem:[%s2248_s3 + $0x78] sm:$0xff]   ;;  %v1701_v26 = vld [vmem:[%s2248_s3 + $0x70] sm:$0xff]   ;;  %vm336_vm12 = vsmask.f32 7440 }
   0x9   :  { %v1700_v25 = vld [vmem:[%s2248_s3 + $0x38] sm:$0xff]   ;;  %1521 = vmatprep.subr.bf16.mxu1 %v1699_v24  ;;  %v1702_v27 = vld [vmem:[%s2248_s3 + $0x30] sm:$0xff]   ;;  %v1703_v28 = vld [vmem:[%s2248_s3 + $0x68] sm:$0xff]  }
   0xa   :  { %202 = vmatpush1.bf16.msra.mxu0 %v1675_v3  ;;  %1522 = vmatpush3.bf16.msra.mxu1 %v1700_v25  ;;  %v1704_v29 = vld [vmem:[%s2248_s3 + $0x28] sm:$0xff]   ;;  %v1705_v30 = vld [vmem:[%s2248_s3 + $0x60] sm:$0xff]   ;;  %v1707_v57 = vld [vmem:[%s2248_s3 + $0x58] sm:$0xff]  }
   0xb   :  { %203 = vmatprep.subr.bf16.mxu0 %v1779_v0  ;;  %1523 = vmatprep.subr.bf16.mxu1 %v1701_v26  ;;  %v1415_v46 = vld [vmem:[%s2249_s2] ss:$0 sm:$0xff]  ;;  %v1708_v60 = vld [vmem:[%s2248_s3 + $0x18] sm:$0xff]   ;;  %v1709_v2 = vld [vmem:[%s2248_s3 + $0x50] sm:$0xff]   ;;  %s1783_s2 = smov 96  }
   0xc   :  { %v1706_v53 = vld [vmem:[%s2248_s3 + $0x20] sm:$0xff]   ;;  %vm1931_vm6 = vmand %vm301_vm2, %vm302_vm3  ;;  %v1727_v24 = vld [vmem:[%s2248_s3 + $0x168] sm:$0xff]   ;;  %vm1382_vm2 = vcmask 261120  }
   0xd   :  { %vm1938_vm7 = vmand %vm306_vm4, %vm307_vm5  ;;  %v1729_v25 = vld [vmem:[%s2248_s3 + $0x128] sm:$0xff]   ;;  %v1731_v26 = vld [vmem:[%s2248_s3 + $0x160] sm:$0xff]  }
   0xe   :  { %204 = vmatpush1.bf16.msra.mxu0 %v1676_v4  ;;  %1524 = vmatpush3.bf16.msra.mxu1 %v1702_v27  ;;  %v1710_v4 = vld [vmem:[%s2248_s3 + $0x10] sm:$0xff]   ;;  %v1733_v27 = vld [vmem:[%s2248_s3 + $0x120] sm:$0xff]   ;;  %vm2026_vm13 = vmor %vm366_vm9, %vm367_vm10 }
   0xf   :  { %205 = vmatprep.subr.bf16.mxu0 %v1779_v0  ;;  %1525 = vmatprep.subr.bf16.mxu1 %v1703_v28  ;;  %v1735_v28 = vld [vmem:[%s2248_s3 + $0x158] sm:$0xff]   ;;  %vm2039_vm14 = vmor %vm335_vm11, %vm336_vm12 }
  0x12   :  { %206 = vmatpush1.bf16.msra.mxu0 %v1677_v5  ;;  %1526 = vmatpush3.bf16.msra.mxu1 %v1704_v29  ;;  %v1737_v29 = vld [vmem:[%s2248_s3 + $0x118] sm:$0xff]  }
  0x13   :  { %207 = vmatprep.subr.bf16.mxu0 %v1779_v0  ;;  %1527 = vmatprep.subr.bf16.mxu1 %v1705_v30  ;;  %v1739_v30 = vld [vmem:[%s2248_s3 + $0x150] sm:$0xff]  }
  0x16   :  { %208 = vmatpush1.bf16.msra.mxu0 %v1678_v7  ;;  %1528 = vmatpush3.bf16.msra.mxu1 %v1706_v53 }
  0x17   :  { %209 = vmatprep.subr.bf16.mxu0 %v1779_v0  ;;  %1529 = vmatprep.subr.bf16.mxu1 %v1707_v57 }
  0x1a   :  { %210 = vmatpush1.bf16.msra.mxu0 %v1679_v8  ;;  %1530 = vmatpush3.bf16.msra.mxu1 %v1708_v60  ;;  %v1711_v8 = vld [vmem:[%s2248_s3 + $0x48] sm:$0xff]  }
  0x1b   :  { %211 = vmatprep.subr.bf16.mxu0 %v1779_v0  ;;  %1531 = vmatprep.subr.bf16.mxu1 %v1709_v2 }
  0x1e   :  { %212 = vmatpush1.bf16.msra.mxu0 %v1680_v9  ;;  %1532 = vmatpush3.bf16.msra.mxu1 %v1710_v4 }
  0x1f   :  { %217 = vmatprep.subr.bf16.mxu0 %v1779_v0  ;;  %1533 = vmatprep.subr.bf16.mxu1 %v1711_v8 }
  0x22   :  { %218 = vmatpush2.bf16.msra.mxu0 %v195_v11 }
  0x23   :  { %219 = vmatprep.subr.bf16.mxu0 %v1779_v0 }
  0x26   :  { %220 = vmatpush2.bf16.msra.mxu0 %v1682_v12 }
  0x27   :  { %221 = vmatprep.subr.bf16.mxu0 %v1779_v0 }
  0x2a   :  { %222 = vmatpush2.bf16.msra.mxu0 %v1683_v13  ;;  %v1712_v13 = vld [vmem:[%s2248_s3 + $0x8] sm:$0xff]  }
  0x2b   :  { %223 = vmatprep.subr.bf16.mxu0 %v1779_v0  ;;  %1534 = vmatpush3.bf16.msra.mxu1 %v1712_v13 }
  0x2e   :  { %224 = vmatpush2.bf16.msra.mxu0 %v1684_v14 }
  0x2f   :  { %225 = vmatprep.subr.bf16.mxu0 %v1779_v0 }
  0x32   :  { %226 = vmatpush2.bf16.msra.mxu0 %v1685_v15  ;;  %v1713_v15 = vld [vmem:[%s2248_s3 + $0x40] sm:$0xff]  }
  0x33   :  { %227 = vmatprep.subr.bf16.mxu0 %v1779_v0  ;;  %1535 = vmatprep.subr.bf16.mxu1 %v1713_v15 }
  0x36   :  { %228 = vmatpush2.bf16.msra.mxu0 %v1686_v16 }
  0x39   :  { %230 = vmatmul.mubr.bf16.vlgmr.msra.gmra.mxu0 %v1687_v17 }
  0x3a   :  { %1412 = vmatprep.mubr.msk.bf16.mxu0 %vm180_vm0, %v1690_v18  ;;  %v1714_v18 = vld [vmem:[%s2248_s3] sm:$0xff]  }
  0x3b   :  { %1536 = vmatpush3.bf16.msra.mxu1 %v1714_v18  ;;  %v1757_v18 = vld [vmem:[%s2248_s3 + $0x1d8] sm:$0xff]  }
  0x41   :  { %238 = vmatmul.mubr.bf16.gmra.mxu0 %v1692_v19  ;;  %v1715_v19 = vld [vmem:[%s2248_s3 + $0xf8] sm:$0xff]  }
  0x42   :  { %1413 = vmatprep.mubr.msk.bf16.mxu0 %vm180_vm0, %v1693_v20  ;;  %v1719_v20 = vld [vmem:[%s2248_s3 + $0x178] sm:$0xff]   ;;  %1543 = vmatprep.subr.bf16.mxu1 %v1715_v19 }
  0x43   :  { %1565 = vmatprep.subr.bf16.mxu0 %v1719_v20 }
  0x49   :  { %246 = vmatmul.mubr.bf16.gmra.mxu0 %v1695_v21  ;;  %v1721_v21 = vld [vmem:[%s2248_s3 + $0x138] sm:$0xff]  }
  0x4a   :  { %1414 = vmatprep.mubr.msk.bf16.mxu0 %vm180_vm0, %v1696_v22  ;;  %v1723_v22 = vld [vmem:[%s2248_s3 + $0x170] sm:$0xff]   ;;  %1566 = vmatpush3.bf16.msra.mxu0 %v1721_v21  ;;  %vm469_vm0 = vcmask 785408  }
  0x4b   :  { %1567 = vmatprep.subr.bf16.mxu0 %v1723_v22 }
  0x51   :  { %254 = vmatmul.mubr.bf16.gmra.mxu0 %v1698_v23  ;;  %v1725_v23 = vld [vmem:[%s2248_s3 + $0x130] sm:$0xff]  }
  0x52   :  { %1568 = vmatpush3.bf16.msra.mxu0 %v1725_v23 }
  0x53   :  { %1569 = vmatprep.subr.bf16.mxu0 %v1727_v24 }
  0x56   :  { %1570 = vmatpush3.bf16.msra.mxu0 %v1729_v25 }
  0x57   :  { %1571 = vmatprep.subr.bf16.mxu0 %v1731_v26 }
  0x5a   :  { %1572 = vmatpush3.bf16.msra.mxu0 %v1733_v27 }
  0x5b   :  { %1573 = vmatprep.subr.bf16.mxu0 %v1735_v28 }
  0x5e   :  { %1574 = vmatpush3.bf16.msra.mxu0 %v1737_v29  ;;  %v1782_v29 = vmov 0.0  }
  0x5f   :  { %1575 = vmatprep.subr.bf16.mxu0 %v1739_v30 }
  0xf9   :  { %v231_v31 = vpop.f32.mrf.mxu0 }
  0xfb   :  { %v233_v32 = vpop.f32.mrf.mxu0 }
  0xfc   :  { %v1743_v32 = vld [vmem:[%s2248_s3 + $0x148] sm:$0xff]  }
  0xfd   :  { %v234_v33 = vpop.f32.mrf.mxu0 }
  0xff   :  { %v236_v34 = vpop.f32.mrf.mxu0 }
 0x101   :  { %v239_v35 = vpop.f32.mrf.mxu0 }
 0x102   :  { %v262_v44 = vmax.f32 %v231_v31, %v239_v35  ;;  %v1741_v31 = vld [vmem:[%s2248_s3 + $0x110] sm:$0xff]  }
 0x103   :  { %v241_v36 = vpop.f32.mrf.mxu0  ;;  %1576 = vmatpush3.bf16.msra.mxu0 %v1741_v31 }
 0x104   :  { %1577 = vmatprep.subr.bf16.mxu0 %v1743_v32  ;;  %v1744_v36 = vld [vmem:[%s2248_s3 + $0x108] sm:$0xff]  }
 0x105   :  { %v242_v37 = vpop.f32.mrf.mxu0 }
 0x106   :  { %v263_v50 = vmax.f32 %v234_v33, %v242_v37 }
 0x107   :  { %v244_v38 = vpop.f32.mrf.mxu0  ;;  %1578 = vmatpush3.bf16.msra.mxu0 %v1744_v36 }
 0x109   :  { %v247_v39 = vpop.f32.mrf.mxu0 }
 0x10b   :  { %v249_v40 = vpop.f32.mrf.mxu0 }
 0x10c   :  { %v1747_v40 = vld [vmem:[%s2248_s3 + $0x140] sm:$0xff]  }
 0x10d   :  { %v250_v41 = vpop.f32.mrf.mxu0  ;;  %1579 = vmatprep.subr.bf16.mxu0 %v1747_v40 }
 0x10f   :  { %v252_v42 = vpop.f32.mrf.mxu0 }
 0x111   :  { %v255_v43 = vpop.f32.mrf.mxu0 }
 0x112   :  { %v264_v45 = vmax.f32 %v247_v39, %v255_v43 }
 0x113   :  { %v257_v47 = vpop.f32.mrf.mxu0 }
 0x114   :  { %v266_v48 = vmax.f32 %v262_v44, %v264_v45 }
 0x115   :  { %v258_v49 = vpop.f32.mrf.mxu0 }
 0x116   :  { %v275_v51 = vadd.f32 %v1415_v46, %v266_v48  ;;  %v265_v52 = vmax.f32 %v250_v41, %v258_v49  ;;  %v1748_v41 = vld [vmem:[%s2248_s3 + $0x100] sm:$0xff]  }
 0x117   :  { %v260_v54 = vpop.f32.mrf.mxu0  ;;  %1580 = vmatpush3.bf16.msra.mxu0 %v1748_v41 }
 0x118   :  { %v277_v55 = vmax.f32 %v275_v51, 0.0  ;;  %v267_v56 = vmax.f32 %v263_v50, %v265_v52  ;;  %1627 = vmatprep.subr.bf16.mxu0 %v1782_v29 }
 0x11a   :  { %v1519_v58 = vpack.c.bf16 %v277_v55, %v277_v55  ;;  %v276_v59 = vadd.f32 %v1415_v46, %v267_v56 }
 0x11c   :  { %v278_v61 = vmax.f32 %v276_v59, 0.0  ;;  %v286_v62 = vshrl.u32 %v1519_v58, 16  ;;  %v289_v1 = vshll.u32 %v1519_v58, 16 }
 0x11e   :  { %v1520_v63 = vpack.c.bf16 %v278_v61, %v278_v61  ;;  %v288_v0 = vrot.slane %v286_v62, 7 }
 0x120   :  { %v291_v5 = vor.u32 %v289_v1, %v288_v0  ;;  %v293_v7 = vshrl.u32 %v1520_v63, 16  ;;  %v296_v11 = vshll.u32 %v1520_v63, 16 }
 0x122   :  { %v304_v9 = vsel %vm1931_vm6, 0, %v291_v5  ;;  %v295_v10 = vrot.slane %v293_v7, 7 }
 0x123   :  { %v309_v12 = vsel %vm1938_vm7, %v304_v9, 0 }
 0x124   :  { %313 = vrot.lane.b32.xlu0 %v309_v12, %s1780_s25  ;;  %v298_v14 = vor.u32 %v296_v11, %v295_v10 }
 0x126   :  { %v305_v16 = vsel %vm1931_vm6, 0, %v298_v14 }
 0x127   :  { %v310_v17 = vsel %vm1938_vm7, %v305_v16, 0 }
 0x128   :  { %315 = vrot.lane.b32.xlu0 %v310_v17, %s1780_s25 }
 0x196   :  { %v314_v33 = vpop.permute.xlu0 %313 }
 0x197   :  { %v320_v34 = vsel %vm317_vm8, 0, %v314_v33  ;;  %v323_v35 = vsel %vm317_vm8, %v314_v33, 0 }
 0x198   :  { %v2009_v37 = vcombine.low %v320_v34, %v320_v34  ;;  %v1424_v38 = vcombine.low %v320_v34, %v323_v35  ;;  %v1425_v39 = vcombine.high %v320_v34, %v323_v35  ;;  %v1419_v51 = vcombine.high %v320_v34, %v320_v34 }
 0x19a   :  { %v388_v42 = vshrl.u32 %v1424_v38, 16  ;;  %v391_v43 = vshll.u32 %v1424_v38, 16  ;;  %v397_v44 = vshll.u32 %v1425_v39, 16  ;;  %v316_v45 = vpop.permute.xlu0 %315  ;;  %v1422_v48 = vrot.slane %v2009_v37, 9 }
 0x19b   :  { %v322_v46 = vsel %vm317_vm8, 0, %v316_v45  ;;  %v324_v47 = vsel %vm317_vm8, %v316_v45, 0  ;;  %v1428_v57 = vrot.slane %v1424_v38, 9  ;;  %v417_v58 = vrot.slane %v1425_v39, 5  ;;  %v1716_v45 = vld [vmem:[%s2248_s3 + $0xb8] sm:$0xff]  }
 0x19c   :  { %v390_v49 = vrot.slane %v388_v42, 4  ;;  %v393_v50 = vrot.slane %v391_v43, 5  ;;  %v1420_v52 = vcombine.low %v322_v46, %v322_v46  ;;  %v1426_v53 = vcombine.low %v322_v46, %v324_v47 }
 0x19d   :  { %v1427_v54 = vcombine.high %v322_v46, %v324_v47  ;;  %v2020_v55 = vcombine.low %v320_v34, %v322_v46  ;;  %v399_v56 = vrot.slane %v397_v44, 5  ;;  %v1433_v2 = vcombine.low %v323_v35, %v324_v47  ;;  %v1718_v47 = vld [vmem:[%s2248_s3 + $0xb0] sm:$0xff]  }
 0x19e   :  { %v394_v59 = vor.u32 %v393_v50, %v390_v49  ;;  %v402_v60 = vshrl.u32 %v1426_v53, 16  ;;  %v405_v61 = vshll.u32 %v1426_v53, 16  ;;  %v1429_v63 = vrot.slane %v1426_v53, 9  ;;  %v1722_v49 = vld [vmem:[%s2248_s3 + $0xa8] sm:$0xff]   ;;  %v1724_v50 = vld [vmem:[%s2248_s3 + $0xe0] sm:$0xff]   ;;  %v1730_v53 = vld [vmem:[%s2248_s3 + $0x98] sm:$0xff]  }
 0x19f   :  { %v411_v62 = vshll.u32 %v1427_v54, 16  ;;  %434 = vrot.lane.b32.xlu1 %v2020_v55, %s1781_s14  ;;  %v421_v1 = vrot.slane %v1427_v54, 5  ;;  %v339_v3 = vshrl.u32 %v2009_v37, 16  ;;  %v342_v4 = vshll.u32 %v2009_v37, 16  ;;  %v1732_v54 = vld [vmem:[%s2248_s3 + $0xd0] sm:$0xff]  }
 0x1a0   :  { %v1423_v5 = vrot.slane %v1420_v52, 9  ;;  %v404_v6 = vrot.slane %v402_v60, 4  ;;  %v407_v7 = vrot.slane %v405_v61, 5  ;;  %v1421_v8 = vcombine.high %v322_v46, %v322_v46  ;;  %v1717_v46 = vld [vmem:[%s2248_s3 + $0xf0] sm:$0xff]   ;;  %v1745_v60 = vld [vmem:[%s2248_s3 + $0x1f8] sm:$0xff]  }
 0x1a1   :  { %v418_v9 = vsel %vm2026_vm13, %v1428_v57, %v417_v58  ;;  %v422_v10 = vsel %vm2026_vm13, %v1429_v63, %v421_v1  ;;  %v341_v11 = vrot.slane %v339_v3, 4  ;;  %v344_v12 = vrot.slane %v342_v4, 5  ;;  %v1738_v57 = vld [vmem:[%s2248_s3 + $0x88] sm:$0xff]   ;;  %v1740_v58 = vld [vmem:[%s2248_s3 + $0xc0] sm:$0xff]   ;;  %v1746_v63 = vld [vmem:[%s2248_s3 + $0x1b8] sm:$0xff]  }
 0x1a2   :  { %v413_v13 = vrot.slane %v411_v62, 5  ;;  %v1436_v14 = vcombine.low %v418_v9, %v422_v10  ;;  %v395_v15 = vrot.slane %v394_v59, 4  ;;  %v408_v16 = vor.u32 %v407_v7, %v404_v6  ;;  %v1742_v59 = vld [vmem:[%s2248_s3 + $0x80] sm:$0xff]   ;;  %v1749_v1 = vld [vmem:[%s2248_s3 + $0x1f0] sm:$0xff]   ;;  %v1751_v6 = vld [vmem:[%s2248_s3 + $0x1e8] sm:$0xff]  }
 0x1a3   :  { %436 = vrot.lane.b32.xlu1 %v1433_v2, %s1781_s14  ;;  %v1437_v17 = vcombine.high %v418_v9, %v422_v10  ;;  %v345_v19 = vor.u32 %v344_v12, %v341_v11  ;;  %v353_v20 = vshrl.u32 %v1420_v52, 16  ;;  %v356_v21 = vshll.u32 %v1420_v52, 16  ;;  %v1728_v52 = vld [vmem:[%s2248_s3 + $0xd8] sm:$0xff]   ;;  %v1750_v4 = vld [vmem:[%s2248_s3 + $0x1b0] sm:$0xff]   ;;  %v1753_v10 = vld [vmem:[%s2248_s3 + $0x1a8] sm:$0xff]  }
 0x1a4   :  { %459 = vrot.lane.b32.xlu0 %v1436_v14, %s1781_s14  ;;  %v409_v22 = vrot.slane %v408_v16, 4  ;;  %v371_v23 = vrot.slane %v1419_v51, 5  ;;  %v375_v24 = vrot.slane %v1421_v8, 5  ;;  %v348_v25 = vshll.u32 %v1419_v51, 16  ;;  %v1726_v51 = vld [vmem:[%s2248_s3 + $0xa0] sm:$0xff]  }
 0x1a5   :  { %v355_v26 = vrot.slane %v353_v20, 4  ;;  %v358_v27 = vrot.slane %v356_v21, 5  ;;  %v362_v28 = vshll.u32 %v1421_v8, 16  ;;  %v400_v30 = vsel %vm2039_vm14, %v395_v15, %v399_v56  ;;  %v1736_v56 = vld [vmem:[%s2248_s3 + $0xc8] sm:$0xff]   ;;  %v1752_v8 = vld [vmem:[%s2248_s3 + $0x238] sm:$0xff]   ;;  %v1754_v12 = vld [vmem:[%s2248_s3 + $0x1e0] sm:$0xff]  }
 0x1a6   :  { %v414_v31 = vsel %vm2039_vm14, %v409_v22, %v413_v13  ;;  %v2052_v32 = vsel %vm2026_vm13, %v1422_v48, %v371_v23  ;;  %v2056_v33 = vsel %vm2026_vm13, %v1423_v5, %v375_v24  ;;  %v346_v35 = vrot.slane %v345_v19, 4  ;;  %v1720_v48 = vld [vmem:[%s2248_s3 + $0xe8] sm:$0xff]   ;;  %v1756_v16 = vld [vmem:[%s2248_s3 + $0x1a0] sm:$0xff]   ;;  %v1759_v20 = vld [vmem:[%s2248_s3 + $0x198] sm:$0xff]  }
 0x1a7   :  { %461 = vrot.lane.b32.xlu1 %v1437_v17, %s1781_s14  ;;  %v1434_v34 = vcombine.low %v400_v30, %v414_v31  ;;  %v359_v36 = vor.u32 %v358_v27, %v355_v26  ;;  %v1435_v37 = vcombine.high %v400_v30, %v414_v31  ;;  %v1432_v38 = vcombine.low %v2052_v32, %v2056_v33  ;;  %v1758_v19 = vld [vmem:[%s2248_s3 + $0x228] sm:$0xff]   ;;  %v1760_v21 = vld [vmem:[%s2248_s3 + $0x1d0] sm:$0xff]   ;;  %v1761_v22 = vld [vmem:[%s2248_s3 + $0x220] sm:$0xff]  }
 0x1a8   :  { %v350_v39 = vrot.slane %v348_v25, 5  ;;  %v364_v41 = vrot.slane %v362_v28, 5  ;;  %v1762_v23 = vld [vmem:[%s2248_s3 + $0x190] sm:$0xff]   ;;  %v1763_v24 = vld [vmem:[%s2248_s3 + $0x1c8] sm:$0xff]   ;;  %v1764_v25 = vld [vmem:[%s2248_s3 + $0x218] sm:$0xff]  }
 0x1a9   :  { %447 = vrot.lane.b32.xlu0 %v1434_v34, %s1781_s14  ;;  %v360_v40 = vrot.slane %v359_v36, 4  ;;  %v1765_v26 = vld [vmem:[%s2248_s3 + $0x188] sm:$0xff]   ;;  %v1766_v27 = vld [vmem:[%s2248_s3 + $0x1c0] sm:$0xff]   ;;  %v1767_v28 = vld [vmem:[%s2248_s3 + $0x210] sm:$0xff]  }
 0x1aa   :  { %v351_v42 = vsel %vm2039_vm14, %v346_v35, %v350_v39  ;;  %v1768_v30 = vld [vmem:[%s2248_s3 + $0x180] sm:$0xff]   ;;  %v1769_v33 = vld [vmem:[%s2248_s3 + $0x208] sm:$0xff]   ;;  %v1771_v39 = vld [vmem:[%s2250_s5 + $0x38] sm:$0xff]  }
 0x1ab   :  { %449 = vrot.lane.b32.xlu1 %v1435_v37, %s1781_s14  ;;  %v365_v43 = vsel %vm2039_vm14, %v360_v40, %v364_v41  ;;  %v1770_v35 = vld [vmem:[%s2248_s3 + $0x200] sm:$0xff]   ;;  %v1772_v40 = vld [vmem:[%s2250_s5 + $0x30] sm:$0xff]   ;;  %v1773_v41 = vld [vmem:[%s2250_s5 + $0x28] sm:$0xff]  }
 0x1ac   :  { %v1431_v44 = vcombine.low %v351_v42, %v365_v43  ;;  %v1774_v42 = vld [vmem:[%s2250_s5 + $0x20] sm:$0xff]   ;;  %v1775_v43 = vld [vmem:[%s2250_s5 + $0x18] sm:$0xff]  }
 0x1ad   :  { %472 = vrot.lane.b32.xlu0 %v1434_v34, %s1783_s2 }
 0x1ae   :  { %1099 = vmatprep.mubr.bf16.mxu1 %v1431_v44  ;;  %v1776_v44 = vld [vmem:[%s2250_s5 + $0x10] sm:$0xff]  }
 0x1af   :  { %474 = vrot.lane.b32.xlu1 %v1435_v37, %s1783_s2  ;;  %1100 = vmatmul.mubr.bf16.vlgmr.msra.gmra.mxu1 %v2020_v55 }
 0x1b0   :  { %1544 = vmatpush3.bf16.msra.mxu1 %v1716_v45  ;;  %v1777_v45 = vld [vmem:[%s2250_s5 + $0x8] sm:$0xff]  }
 0x1b1   :  { %465 = vrot.lane.b32.xlu0 %v2020_v55, %s1783_s2  ;;  %1545 = vmatprep.subr.bf16.mxu1 %v1717_v46  ;;  %v1734_v55 = vld [vmem:[%s2248_s3 + $0x90] sm:$0xff]   ;;  %v1778_v46 = vld [vmem:[%s2250_s5] sm:$0xff]  }
 0x1b3   :  { %467 = vrot.lane.b32.xlu1 %v1433_v2, %s1783_s2 }
 0x1b4   :  { %1546 = vmatpush3.bf16.msra.mxu1 %v1718_v47 }
 0x1b5   :  { %478 = vrot.lane.b32.xlu0 %v1436_v14, %s1783_s2  ;;  %1547 = vmatprep.subr.bf16.mxu1 %v1720_v48  ;;  %v1755_v14 = vld [vmem:[%s2248_s3 + $0x230] sm:$0xff]  }
 0x1b7   :  { %480 = vrot.lane.b32.xlu1 %v1437_v17, %s1783_s2 }
 0x1b8   :  { %1548 = vmatpush3.bf16.msra.mxu1 %v1722_v49 }
 0x1b9   :  { %1549 = vmatprep.subr.bf16.mxu1 %v1724_v50 }
 0x1bc   :  { %1550 = vmatpush3.bf16.msra.mxu1 %v1726_v51 }
 0x1bd   :  { %1551 = vmatprep.subr.bf16.mxu1 %v1728_v52 }
 0x1c0   :  { %1552 = vmatpush3.bf16.msra.mxu1 %v1730_v53 }
 0x1c1   :  { %1553 = vmatprep.subr.bf16.mxu1 %v1732_v54 }
 0x1c4   :  { %1554 = vmatpush3.bf16.msra.mxu1 %v1734_v55 }
 0x1c5   :  { %1555 = vmatprep.subr.bf16.mxu1 %v1736_v56 }
 0x1c8   :  { %1556 = vmatpush3.bf16.msra.mxu1 %v1738_v57 }
 0x1c9   :  { %1557 = vmatprep.subr.bf16.mxu1 %v1740_v58  ;;  %v1438_v58 = vld [vmem:[%s2251_s4] ss:$0 sm:$0xff] }
 0x1cc   :  { %1558 = vmatpush3.bf16.msra.mxu1 %v1742_v59 }
 0x1cd   :  { %1587 = vmatprep.subr.bf16.mxu1 %v1745_v60 }
 0x211   :  { %v435_v61 = vpop.permute.xlu1 %434 }
 0x215   :  { %v437_v62 = vpop.permute.xlu1 %436 }
 0x216   :  { %v439_v0 = vsel %vm438_vm15, %v435_v61, %v437_v62  ;;  %v460_v2 = vpop.permute.xlu0 %459 }
 0x217   :  { %1140 = vmatprep.mubr.bf16.mxu1 %v439_v0 }
 0x218   :  { %1141 = vmatmul.mubr.bf16.vlgmr.msra.gmra.mxu1 %v1432_v38 }
 0x219   :  { %1588 = vmatpush3.bf16.msra.mxu1 %v1746_v63  ;;  %v462_v3 = vpop.permute.xlu1 %461 }
 0x21a   :  { %v463_v5 = vsel %vm438_vm15, %v460_v2, %v462_v3  ;;  %1589 = vmatprep.subr.bf16.mxu1 %v1749_v1 }
 0x21b   :  { %1181 = vmatprep.mubr.bf16.mxu0 %v463_v5  ;;  %v448_v7 = vpop.permute.xlu0 %447 }
 0x21d   :  { %1590 = vmatpush3.bf16.msra.mxu1 %v1750_v4  ;;  %v450_v9 = vpop.permute.xlu1 %449 }
 0x21e   :  { %v451_v11 = vsel %vm438_vm15, %v448_v7, %v450_v9  ;;  %1591 = vmatprep.subr.bf16.mxu1 %v1751_v6 }
 0x21f   :  { %1182 = vmatmul.mubr.bf16.vlgmr.msra.gmra.mxu0 %v451_v11  ;;  %v473_v13 = vpop.permute.xlu0 %472 }
 0x220   :  { %1628 = vmatpush3.bf16.msra.mxu0 %v1752_v8  ;;  %1643 = vmatprep.mubr.msk.bf16.mxu0 %vm1784_vm1, %v1782_v29 }
 0x221   :  { %1592 = vmatpush3.bf16.msra.mxu1 %v1753_v10  ;;  %v475_v15 = vpop.permute.xlu1 %474  ;;  %1629 = vmatprep.subr.bf16.mxu0 %v1782_v29 }
 0x222   :  { %1593 = vmatprep.subr.bf16.mxu1 %v1754_v12  ;;  %v476_v17 = vsel %vm469_vm0, %v473_v13, %v475_v15 }
 0x223   :  { %1222 = vmatprep.mubr.bf16.mxu1 %v476_v17  ;;  %v466_v31 = vpop.permute.xlu0 %465 }
 0x224   :  { %1630 = vmatpush3.bf16.msra.mxu0 %v1755_v14 }
 0x225   :  { %1594 = vmatpush3.bf16.msra.mxu1 %v1756_v16  ;;  %1631 = vmatprep.subr.bf16.mxu0 %v1782_v29  ;;  %v468_v32 = vpop.permute.xlu1 %467 }
 0x226   :  { %1595 = vmatprep.subr.bf16.mxu1 %v1757_v18  ;;  %v470_v34 = vsel %vm469_vm0, %v466_v31, %v468_v32 }
 0x227   :  { %v479_v36 = vpop.permute.xlu0 %478 }
 0x228   :  { %1632 = vmatpush3.bf16.msra.mxu0 %v1758_v19 }
 0x229   :  { %1596 = vmatpush3.bf16.msra.mxu1 %v1759_v20  ;;  %1633 = vmatprep.subr.bf16.mxu0 %v1782_v29  ;;  %v481_v37 = vpop.permute.xlu1 %480 }
 0x22a   :  { %1597 = vmatprep.subr.bf16.mxu1 %v1760_v21  ;;  %v482_v38 = vsel %vm469_vm0, %v479_v36, %v481_v37 }
 0x22c   :  { %1634 = vmatpush3.bf16.msra.mxu0 %v1761_v22 }
 0x22d   :  { %1598 = vmatpush3.bf16.msra.mxu1 %v1762_v23  ;;  %1635 = vmatprep.subr.bf16.mxu0 %v1782_v29 }
 0x22e   :  { %1599 = vmatprep.subr.bf16.mxu1 %v1763_v24  ;;  %v1292_v24 = vstv %s2252_s6 }
 0x230   :  { %1636 = vmatpush3.bf16.msra.mxu0 %v1764_v25 }
 0x231   :  { %1600 = vmatpush3.bf16.msra.mxu1 %v1765_v26  ;;  %1637 = vmatprep.subr.bf16.mxu0 %v1782_v29 }
 0x232   :  { %1601 = vmatprep.subr.bf16.mxu1 %v1766_v27 }
 0x234   :  { %1638 = vmatpush3.bf16.msra.mxu0 %v1767_v28 }
 0x235   :  { %1602 = vmatpush3.bf16.msra.mxu1 %v1768_v30  ;;  %1639 = vmatprep.subr.bf16.mxu0 %v1782_v29 }
 0x236   :  { %1647 = vmatprep.subr.bf16.mxu1 %v1782_v29 }
 0x238   :  { %1223 = vmatmul.mubr.bf16.vlgmr.msra.gmra.mxu1 %v470_v34  ;;  %1640 = vmatpush3.bf16.msra.mxu0 %v1769_v33 }
 0x239   :  { %1641 = vmatprep.subr.bf16.mxu0 %v1782_v29  ;;  %1663 = vmatprep.mubr.msk.bf16.mxu1 %vm1784_vm1, %v1782_v29 }
 0x23a   :  { %1648 = vmatpush3.bf16.msra.mxu1 %v1771_v39 }
 0x23b   :  { %1649 = vmatprep.subr.bf16.mxu1 %v1782_v29 }
 0x23c   :  { %1642 = vmatpush3.bf16.msra.mxu0 %v1770_v35 }
 0x23e   :  { %1650 = vmatpush3.bf16.msra.mxu1 %v1772_v40 }
 0x23f   :  { %1644 = vmatmul.mubr.bf16.vlgmr.msra.gmra.mxu0 %v482_v38  ;;  %1651 = vmatprep.subr.bf16.mxu1 %v1782_v29 }
 0x242   :  { %1652 = vmatpush3.bf16.msra.mxu1 %v1773_v41 }
 0x243   :  { %1653 = vmatprep.subr.bf16.mxu1 %v1782_v29 }
 0x246   :  { %1654 = vmatpush3.bf16.msra.mxu1 %v1774_v42 }
 0x247   :  { %1655 = vmatprep.subr.bf16.mxu1 %v1782_v29 }
 0x24a   :  { %1656 = vmatpush3.bf16.msra.mxu1 %v1775_v43 }
 0x24b   :  { %1657 = vmatprep.subr.bf16.mxu1 %v1782_v29 }
 0x24e   :  { %1658 = vmatpush3.bf16.msra.mxu1 %v1776_v44 }
 0x24f   :  { %1659 = vmatprep.subr.bf16.mxu1 %v1782_v29 }
 0x252   :  { %1660 = vmatpush3.bf16.msra.mxu1 %v1777_v45 }
 0x253   :  { %1661 = vmatprep.subr.bf16.mxu1 %v1782_v29 }
 0x256   :  { %1662 = vmatpush3.bf16.msra.mxu1 %v1778_v46 }
 0x26f   :  { %v1537_v47 = vpop.f32.mrf.mxu1 }
 0x271   :  { %v1538_v48 = vpop.f32.mrf.mxu1 }
 0x272   :  { %v1539_v56 = vadd.f32 %v1538_v48, %v1537_v47 }
 0x273   :  { %v1540_v49 = vpop.f32.mrf.mxu1 }
 0x274   :  { %v1102_v29 = vadd.f32 %v1539_v56, %v1438_v58 }
 0x275   :  { %v1541_v50 = vpop.f32.mrf.mxu1 }
 0x276   :  { %v1542_v61 = vadd.f32 %v1541_v50, %v1540_v49 }
 0x278   :  { %v1105_v4 = vadd.f32 %v1542_v61, %v1438_v58 }
 0x2d8   :  { %v1559_v51 = vpop.f32.mrf.mxu1 }
 0x2da   :  { %v1560_v53 = vpop.f32.mrf.mxu1 }
 0x2db   :  { %v1561_v59 = vadd.f32 %v1560_v53, %v1559_v51 }
 0x2dc   :  { %v1562_v55 = vpop.f32.mrf.mxu1 }
 0x2dd   :  { %v1143_v2 = vadd.f32 %v1561_v59, %v1102_v29 }
 0x2de   :  { %v1563_v60 = vpop.f32.mrf.mxu1 }
 0x2df   :  { %v1581_v52 = vpop.f32.mrf.mxu0  ;;  %v1564_v1 = vadd.f32 %v1563_v60, %v1562_v55 }
 0x2e1   :  { %v1582_v54 = vpop.f32.mrf.mxu0  ;;  %v1146_v9 = vadd.f32 %v1564_v1, %v1105_v4 }
 0x2e2   :  { %v1583_v62 = vadd.f32 %v1582_v54, %v1581_v52 }
 0x2e3   :  { %v1584_v57 = vpop.f32.mrf.mxu0 }
 0x2e4   :  { %v1184_v7 = vadd.f32 %v1583_v62, %v1143_v2 }
 0x2e5   :  { %v1585_v63 = vpop.f32.mrf.mxu0 }
 0x2e6   :  { %v1586_v5 = vadd.f32 %v1585_v63, %v1584_v57 }
 0x2e8   :  { %v1187_v12 = vadd.f32 %v1586_v5, %v1146_v9 }
 0x2f8   :  { %v1603_v0 = vpop.f32.mrf.mxu1 }
 0x2fa   :  { %v1604_v3 = vpop.f32.mrf.mxu1 }
 0x2fb   :  { %v1605_v6 = vadd.f32 %v1604_v3, %v1603_v0 }
 0x2fc   :  { %v1606_v8 = vpop.f32.mrf.mxu1 }
 0x2fd   :  { %v1225_v11 = vadd.f32 %v1605_v6, %v1184_v7 }
 0x2fe   :  { %v1607_v10 = vpop.f32.mrf.mxu1 }
 0x2ff   :  { %v1608_v13 = vadd.f32 %v1607_v10, %v1606_v8  ;;  %v1265_v14 = vpop.f32.mrf.mxu0 }
 0x300   :  { %v1266_v17 = vadd.f32 %v1265_v14, %v1225_v11 }
 0x301   :  { %v1645_v15 = vpop.f32.mrf.mxu0  ;;  %v1228_v16 = vadd.f32 %v1608_v13, %v1187_v12 }
 0x302   :  { %v1272_v21 = vmax.f32 %v1266_v17, 0.0 }
 0x303   :  { %v1268_v18 = vpop.f32.mrf.mxu0 }
 0x304   :  { %v1269_v19 = vadd.f32 %v1268_v18, %v1228_v16 }
 0x305   :  { %v1646_v20 = vpop.f32.mrf.mxu0 }
 0x306   :  { %v1273_v22 = vmax.f32 %v1269_v19, 0.0 }
 0x308   :  { %v1274_v23 = vpack.c.bf16 %v1273_v22, %v1272_v21 }
 0x30a   :  { %1664 = vmatmul.mubr.bf16.vlgmr.msra.gmra.mxu1 %v1274_v23 }
 0x3ca   :  { %v1375_v25 = vpop.f32.mrf.mxu1 }
 0x3cb   :  { %v1376_v26 = vadd.f32 %v1375_v25, %v1292_v24 }
 0x3cc   :  { %v1665_v27 = vpop.f32.mrf.mxu1 }
 0x3cd   :  { %1383 = vst.msk [vmem:[%s2253_s7] sm:$0xff] %vm1382_vm2, %v1376_v26 }
 0x3ce   :  { %v1378_v28 = vpop.f32.mrf.mxu1 }
 0x3cf   :  { %v1379_v30 = vadd.f32 %v1378_v28, %v1292_v24 }
 0x3d0   :  { %v1666_v31 = vpop.f32.mrf.mxu1 }
 0x3d1   :  { %1384 = vst.msk [vmem:[%s2253_s7 + $0x8] sm:$0xff] %vm1382_vm2, %v1379_v30 }

</bundles_post_ra>
